<compile_context>
chip_gen: v7x
topology: tpu7x:2x2x1
jax: 0.10.0
libtpu: 0.0.40
codegen_flags: <defaults>
</compile_context>

<pallas_src>
import functools

import jax
import jax.numpy as jnp
from jax.experimental import pallas as pl
from jax.experimental.pallas import tpu as pltpu


def _round_up(x, m):
    return ((x + m - 1) // m) * m


# ----------------------------- Pallas kernels ------------------------------


def _matmul_bias_kernel(x_ref, w_ref, bias_ref, o_ref, *, relu):
    # x_ref: (tm, K) bf16, w_ref: (K, Cp) bf16 (BN scale pre-folded),
    # bias_ref: (1, Cp) f32, o_ref: (tm, Cp)
    acc = jnp.dot(x_ref[...], w_ref[...], preferred_element_type=jnp.float32)
    y = acc + bias_ref[...]
    if relu:
        y = jnp.maximum(y, 0.0)
    o_ref[...] = y.astype(o_ref.dtype)


def _matmul_bias_add_relu_kernel(x_ref, w_ref, bias_ref, res_ref, o_ref):
    # conv2 of `features`: matmul + BN bias + residual add + final ReLU, fused.
    acc = jnp.dot(x_ref[...], w_ref[...], preferred_element_type=jnp.float32)
    y = acc + bias_ref[...] + res_ref[...].astype(jnp.float32)
    o_ref[...] = jnp.maximum(y, 0.0).astype(o_ref.dtype)


def _conv_as_matmul(patches, w_mat, scale, bias, *, relu, residual=None,
                    out_dtype=jnp.bfloat16, tm=256):
    """(patches @ (w_mat*scale)) + bias [+ residual] [ReLU], bf16 MXU / f32 acc."""
    M, K = patches.shape
    C = w_mat.shape[1]

    # Fold BN scale into the weights once per call (wrapper side, O(K*C)).
    w_scaled = w_mat.astype(jnp.float32) * scale.astype(jnp.float32)[None, :]

    # Lane-dense output: pad Cout to a multiple of 128.
    Cp = _round_up(C, 128)
    bias_f32 = bias.astype(jnp.float32)
    if Cp != C:
        w_scaled = jnp.pad(w_scaled, ((0, 0), (0, Cp - C)))
        bias_f32 = jnp.pad(bias_f32, (0, Cp - C))
    bias2 = bias_f32.reshape(1, Cp)

    # bf16 MXU operands.
    w_bf = w_scaled.astype(jnp.bfloat16)
    x_bf = patches.astype(jnp.bfloat16)

    # Tile M; pad to a multiple of tm instead of requiring divisibility.
    tm = min(tm, _round_up(M, 8))
    Mp = _round_up(M, tm)
    if Mp != M:
        x_bf = jnp.pad(x_bf, ((0, Mp - M), (0, 0)))
    grid = (Mp // tm,)

    in_specs = [
        pl.BlockSpec((tm, K), lambda i: (i, 0)),
        pl.BlockSpec((K, Cp), lambda i: (0, 0)),
        pl.BlockSpec((1, Cp), lambda i: (0, 0)),
    ]
    args = [x_bf, w_bf, bias2]

    if residual is not None:
        res = residual.astype(jnp.bfloat16)
        if Cp != C:
            res = jnp.pad(res, ((0, 0), (0, Cp - C)))
        if Mp != M:
            res = jnp.pad(res, ((0, Mp - M), (0, 0)))
        in_specs.append(pl.BlockSpec((tm, Cp), lambda i: (i, 0)))
        args.append(res)
        kernel = _matmul_bias_add_relu_kernel
    else:
        kernel = functools.partial(_matmul_bias_kernel, relu=relu)

    out_itemsize = jnp.dtype(out_dtype).itemsize
    bytes_accessed = (Mp * K * 2 + K * Cp * 2 + Cp * 4 + Mp * Cp * out_itemsize
                      + (Mp * Cp * 2 if residual is not None else 0))
    cost = pl.CostEstimate(flops=2 * Mp * K * Cp, transcendentals=0,
                           bytes_accessed=bytes_accessed)

    out = pl.pallas_call(
        kernel,
        out_shape=jax.ShapeDtypeStruct((Mp, Cp), out_dtype),
        grid_spec=pltpu.PrefetchScalarGridSpec(
            num_scalar_prefetch=0,
            grid=grid,
            in_specs=in_specs,
            out_specs=pl.BlockSpec((tm, Cp), lambda i: (i, 0)),
        ),
        compiler_params=pltpu.CompilerParams(dimension_semantics=("parallel",)),
        cost_estimate=cost,
    )(*args)
    return out[:M, :C]


# ------------------------------- JAX glue ----------------------------------


def _im2col_3x3(x_nhwc, stride):
    """3x3, pad=1 im2col (kept in the input dtype, bf16). -> ((N*Ho*Wo, 9*C), dims)."""
    N, H, W, C = x_nhwc.shape
    xp = jnp.pad(x_nhwc, ((0, 0), (1, 1), (1, 1), (0, 0)))
    Ho = (H - 1) // stride + 1
    Wo = (W - 1) // stride + 1
    cols = []
    for kh in range(3):
        for kw in range(3):
            sl = xp[
                :,
                kh: kh + stride * (Ho - 1) + 1: stride,
                kw: kw + stride * (Wo - 1) + 1: stride,
                :,
            ]
            cols.append(sl)
    patches = jnp.concatenate(cols, axis=-1)  # (N, Ho, Wo, 9*C)
    return patches.reshape(N * Ho * Wo, 9 * C), (N, Ho, Wo)


def _fold_bn(gamma, beta, mean, var, eps=1e-5):
    scale = gamma / jnp.sqrt(var + eps)
    bias = beta - mean * scale
    return scale, bias


def _w3x3_to_mat(w):  # torch layout (Cout, Cin, 3, 3) -> (9*Cin, Cout)
    cout, cin = w.shape[0], w.shape[1]
    return jnp.transpose(w, (2, 3, 1, 0)).reshape(9 * cin, cout)


def basic_block_forward(x_nchw, params, stride):
    """Forward pass of the PyTorch BasicBlock. Input/output are NCHW float32."""
    x = jnp.transpose(x_nchw, (0, 2, 3, 1)).astype(jnp.float32)  # -> NHWC
    N, H, W, Cin = x.shape
    Cout = params["w1"].shape[0]

    s1, b1 = _fold_bn(*params["bn1"])
    s2, b2 = _fold_bn(*params["bn2"])

    # bf16 activations for all HBM-resident intermediates / matmul operands.
    x_bf = x.astype(jnp.bfloat16)

    # conv1 (3x3, stride) + BN + ReLU
    p1, (n, Ho, Wo) = _im2col_3x3(x_bf, stride)
    y1 = _conv_as_matmul(p1, _w3x3_to_mat(params["w1"]), s1, b1,
                         relu=True, out_dtype=jnp.bfloat16)
    y1 = y1.reshape(n, Ho, Wo, Cout)

    # shortcut branch
    if stride != 1 or Cin != Cout:
        ss, bs = _fold_bn(*params["bns"])
        ws = params["ws"]  # (Cout, Cin, 1, 1)
        w_s = jnp.transpose(ws[:, :, 0, 0], (1, 0))  # (Cin, Cout)
        xs = x_bf[:, ::stride, ::stride, :].reshape(N * Ho * Wo, Cin)
        sc = _conv_as_matmul(xs, w_s, ss, bs, relu=False, out_dtype=jnp.bfloat16)
    else:
        sc = x_bf.reshape(N * Ho * Wo, Cin)

    # conv2 (3x3, stride 1) + BN + residual add + ReLU (fused in one kernel)
    p2, _ = _im2col_3x3(y1, 1)
    out = _conv_as_matmul(p2, _w3x3_to_mat(params["w2"]), s2, b2, relu=False,
                          residual=sc, out_dtype=jnp.float32)
    out = out.reshape(N, Ho, Wo, Cout)
    return jnp.transpose(out, (0, 3, 1, 2))  # -> NCHW


# -------------------- reference (pure JAX, f32) for validation -------------


def _conv3x3_ref(x, w, stride):
    return jax.lax.conv_general_dilated(
        x,
        jnp.transpose(w, (2, 3, 1, 0)),
        window_strides=(stride, stride),
        padding=((1, 1), (1, 1)),
        dimension_numbers=("NHWC", "HWIO", "NHWC"),
        precision=jax.lax.Precision.HIGHEST,
    )


def basic_block_ref(x_nchw, params, stride):
    x = jnp.transpose(x_nchw, (0, 2, 3, 1)).astype(jnp.float32)
    Cin = x.shape[-1]
    Cout = params["w1"].shape[0]
    s1, b1 = _fold_bn(*params["bn1"])
    s2, b2 = _fold_bn(*params["bn2"])
    y = jnp.maximum(_conv3x3_ref(x, params["w1"], stride) * s1 + b1, 0.0)
    y = _conv3x3_ref(y, params["w2"], 1) * s2 + b2
    if stride != 1 or Cin != Cout:
        ss, bs = _fold_bn(*params["bns"])
        sc = jax.lax.conv_general_dilated(
            x,
            jnp.transpose(params["ws"], (2, 3, 1, 0)),
            window_strides=(stride, stride),
            padding=((0, 0), (0, 0)),
            dimension_numbers=("NHWC", "HWIO", "NHWC"),
            precision=jax.lax.Precision.HIGHEST,
        )
        sc = sc * ss + bs
    else:
        sc = x
    out = jnp.maximum(y + sc, 0.0)
    return jnp.transpose(out, (0, 3, 1, 2))


# --------------------------------- main -------------------------------------


def init_params(key, cin, cout, stride):
    ks = jax.random.split(key, 16)
    bn = lambda ka, kb, kc, kd, c: (
        jax.random.uniform(ka, (c,), jnp.float32, 0.5, 1.5),  # gamma
        0.1 * jax.random.normal(kb, (c,), jnp.float32),       # beta
        0.1 * jax.random.normal(kc, (c,), jnp.float32),       # running_mean
        jax.random.uniform(kd, (c,), jnp.float32, 0.5, 1.5),  # running_var
    )
    params = {
        "w1": 0.1 * jax.random.normal(ks[0], (cout, cin, 3, 3), jnp.float32),
        "bn1": bn(ks[1], ks[2], ks[3], ks[4], cout),
        "w2": 0.1 * jax.random.normal(ks[5], (cout, cout, 3, 3), jnp.float32),
        "bn2": bn(ks[6], ks[7], ks[8], ks[9], cout),
    }
    if stride != 1 or cin != cout:
        params["ws"] = 0.1 * jax.random.normal(ks[10], (cout, cin, 1, 1), jnp.float32)
        params["bns"] = bn(ks[11], ks[12], ks[13], ks[14], cout)
    return params


if __name__ == "__main__":
    key = jax.random.PRNGKey(0)
    kx, kp = jax.random.split(key)

    # small shapes: batch=2, in_channels=4, out_channels=8, spatial=16, stride=2
    # (stride != 1 exercises the 1x1-conv shortcut path)
    N, CIN, COUT, H, W, STRIDE = 2, 4, 8, 16, 16, 2
    x = jax.random.normal(kx, (N, CIN, H, W), jnp.float32)  # NCHW like PyTorch
    params = init_params(kp, CIN, COUT, STRIDE)

    out = basic_block_forward(x, params, STRIDE)
    out = jax.block_until_ready(out)

    ref = jax.block_until_ready(basic_block_ref(x, params, STRIDE))
    assert out.shape == (N, COUT, H // STRIDE, W // STRIDE), out.shape
    # bf16 operands / bf16 intermediates vs f32-HIGHEST reference -> looser tolerance.
    if not jnp.allclose(out, ref, rtol=3e-2, atol=3e-2):
        err = float(jnp.max(jnp.abs(out - ref)))
        raise AssertionError(f"Pallas BasicBlock output mismatch vs JAX reference (max abs err={err})")

    print("KERNEL_OK")
</pallas_src>

<mosaic_0001>
module attributes {stable_mosaic.version = 11 : i64} {
  func.func @_matmul_bias_kernel(%arg0: i32, %arg1: memref<128x36xbf16, #tpu.memory_space<vmem>>, %arg2: memref<36x128xbf16, #tpu.memory_space<vmem>>, %arg3: memref<1x128xf32, #tpu.memory_space<vmem>>, %arg4: memref<128x128xbf16, #tpu.memory_space<vmem>>) attributes {dimension_semantics = [#tpu.dimension_semantics<parallel>], iteration_bounds = array<i64: 1>, scalar_prefetch = 0 : i64, scratch_operands = 0 : i64, tpu.core_type = #tpu.core_type<tc>, window_params = [{transform_indices = @transform_0, window_bounds = array<i64: 128, 36>}, {pipeline_mode = #tpu.pipeline_mode<synchronous>, transform_indices = @transform_1, window_bounds = array<i64: 36, 128>}, {pipeline_mode = #tpu.pipeline_mode<synchronous>, transform_indices = @transform_2, window_bounds = array<i64: 1, 128>}, {transform_indices = @transform_3, window_bounds = array<i64: 128, 128>}]} {
    %c0 = arith.constant 0 : index
    %c0_0 = arith.constant 0 : index
    %0 = vector.load %arg1[%c0, %c0_0] : memref<128x36xbf16, #tpu.memory_space<vmem>>, vector<128x36xbf16>
    %c0_1 = arith.constant 0 : index
    %c0_2 = arith.constant 0 : index
    %1 = vector.load %arg2[%c0_1, %c0_2] : memref<36x128xbf16, #tpu.memory_space<vmem>>, vector<36x128xbf16>
    %cst = arith.constant dense<0.000000e+00> : vector<128x128xf32>
    %2 = tpu.matmul %0, %1, %cst {dimension_numbers = #tpu.dot_dimension_numbers<[1], [0], [0], [1], [0, 0, 1, 1], [], []>} : vector<128x36xbf16>, vector<36x128xbf16>, vector<128x128xf32> -> vector<128x128xf32>
    %c0_3 = arith.constant 0 : index
    %c0_4 = arith.constant 0 : index
    %3 = vector.load %arg3[%c0_3, %c0_4] : memref<1x128xf32, #tpu.memory_space<vmem>>, vector<1x128xf32>
    %4 = vector.broadcast %3 : vector<1x128xf32> to vector<128x128xf32>
    %5 = arith.addf %2, %4 : vector<128x128xf32>
    %cst_5 = arith.constant 0.000000e+00 : f32
    %6 = vector.broadcast %cst_5 : f32 to vector<128x128xf32>
    %7 = arith.maximumf %5, %6 : vector<128x128xf32>
    %8 = arith.truncf %7 : vector<128x128xf32> to vector<128x128xbf16>
    %c0_6 = arith.constant 0 : index
    %c0_7 = arith.constant 0 : index
    %9 = vector.load %arg4[%c0_6, %c0_7] : memref<128x128xbf16, #tpu.memory_space<vmem>>, vector<128x128xbf16>
    tpu.vector_store %arg4[%c0_6, %c0_7], %8 {strides = array<i32>} : memref<128x128xbf16, #tpu.memory_space<vmem>>, vector<128x128xbf16>,
    return
  }
  func.func @transform_0(%arg0: i32) -> (i32, i32) {
    %c0_i32 = arith.constant 0 : i32
    %c0_i32_0 = arith.constant 0 : i32
    return %arg0, %c0_i32 : i32, i32
  }
  func.func @transform_1(%arg0: i32) -> (i32, i32) {
    %c0_i32 = arith.constant 0 : i32
    %c0_i32_0 = arith.constant 0 : i32
    %c0_i32_1 = arith.constant 0 : i32
    return %c0_i32, %c0_i32_0 : i32, i32
  }
  func.func @transform_2(%arg0: i32) -> (i32, i32) {
    %c0_i32 = arith.constant 0 : i32
    %c0_i32_0 = arith.constant 0 : i32
    %c0_i32_1 = arith.constant 0 : i32
    return %c0_i32, %c0_i32_0 : i32, i32
  }
  func.func @transform_3(%arg0: i32) -> (i32, i32) {
    %c0_i32 = arith.constant 0 : i32
    %c0_i32_0 = arith.constant 0 : i32
    return %arg0, %c0_i32 : i32, i32
  }
}

</mosaic_0001>

<bundles_post_ra>
// kernel: tpu_custom_call.1
= control target key start
LH: loop header
LB: loop body
LE: loop exit
PB: predicated region body
PF: predicated region fallthrough
CT: control target
= control target key end

     0   :  { %vm99_vm0 = vcmask 293888   ;;  %vm124_vm1 = vcmask 1041408   ;;  %s594_s0 = inlined_call_operand.vmem [shape: bf16[128,36], index: 0, kind: input, shape index: {}]   ;;  %s595_s1 = inlined_call_operand.vmem [shape: bf16[36,128], index: 1, kind: input, shape index: {}]   ;;  %s596_s2 = inlined_call_operand.vmem [shape: f32[1,128], index: 2, kind: input, shape index: {}]   ;;  %s597_s3 = inlined_call_operand.hbm [shape: bf16[128,128], index: 3, kind: output, shape index: {}]  }
   0x1   :  { %v480_v0 = vld [vmem:[%s595_s1] sm:$0xff]   ;;  %v481_v1 = vld [vmem:[%s595_s1 + $0x8] sm:$0xff]   ;;  %v482_v2 = vld [vmem:[%s595_s1 + $0x10] ss:$0 sps:$4 sm:$0x33]  }
   0x2   :  { %447 = vmatprep.subr.bf16.mxu0 %v480_v0  ;;  %469 = vmatprep.subr.bf16.mxu1 %v480_v0  ;;  %v483_v3 = vld [vmem:[%s594_s0] sm:$0xff]   ;;  %v126_v5 = vsel %vm124_vm1, %v482_v2, 0  ;;  %v485_v6 = vld [vmem:[%s594_s0 + $0x8] sm:$0xff]  }
   0x3   :  { %448 = vmatpush3.bf16.msra.mxu0 %v480_v0  ;;  %472 = vmatpush3.bf16.msra.mxu1 %v480_v0  ;;  %v484_v4 = vld [vmem:[%s594_s0 + $0x20] sm:$0xff]   ;;  %v486_v7 = vld [vmem:[%s594_s0 + $0x28] sm:$0xff]  }
   0x4   :  { %449 = vmatprep.subr.bf16.mxu0 %v481_v1  ;;  %470 = vmatprep.subr.bf16.mxu1 %v481_v1 }
   0x5   :  { %453 = vmatprep.mubr.msk.bf16.mxu0 %vm99_vm0, %v483_v3  ;;  %461 = vmatprep.mubr.msk.bf16.mxu1 %vm99_vm0, %v484_v4 }
   0x7   :  { %450 = vmatpush3.bf16.msra.mxu0 %v481_v1  ;;  %473 = vmatpush3.bf16.msra.mxu1 %v481_v1 }
   0x8   :  { %475 = vmatprep.subr.msk.bf16.mxu0 %vm124_vm1, %v482_v2  ;;  %476 = vmatprep.subr.msk.bf16.mxu1 %vm124_vm1, %v482_v2 }
   0x9   :  { %8 = vsyncpa [#allocation3], 0  ;;  %v487_v8 = vld [vmem:[%s594_s0 + $0x10] sm:$0xff]   ;;  %v489_v10 = vld [vmem:[%s594_s0 + $0x18] sm:$0xff]  }
   0xa   :  { %v488_v9 = vld [vmem:[%s594_s0 + $0x30] sm:$0xff]   ;;  %v490_v11 = vld [vmem:[%s594_s0 + $0x38] sm:$0xff]   ;;  %v337_v12 = vld [vmem:[%s596_s2] ss:$0 sm:$0xff]  ;;  %s515_s0 = smov [#allocation2]  }
   0xb   :  { %452 = vmatpush3.bf16.msra.mxu0 %v126_v5  ;;  %474 = vmatpush3.bf16.msra.mxu1 %v126_v5  ;;  %s326_s2 = sshll.u32 %s515_s0, 4  ;;  %s327_s2 = int_to_ptr.vmem [resolvable:$true] %s326_s2 }
   0xc   :  { %s491_s8 = scalar_lea.vmem %s327_s2, 1024  ;;  %p496_p1 = scmp.lt.s32.totalorder %s327_s2, %s327_s2 }
   0xd   :  { %p492_p0 = scmp.ne.s32.totalorder %s327_s2, %s491_s8  ;;  %p497_p2 = scmp.lt.s32.totalorder %s491_s8, %s491_s8 }
   0xe   :  { %454 = vmatmul.mubr.msk.bf16.vlgmr.msra.gmra.mrb[0].mxu0 %vm99_vm0, %v485_v6  ;;  %462 = vmatmul.mubr.msk.bf16.vlgmr.msra.gmra.mrb[0].mxu1 %vm99_vm0, %v486_v7 }
   0xf   :  { %457 = vmatprep.mubr.msk.bf16.mxu0 %vm99_vm0, %v487_v8  ;;  %465 = vmatprep.mubr.msk.bf16.mxu1 %vm99_vm0, %v488_v9  ;;  %p498_p3 = por %p497_p2, %p496_p1 }
  0x11   :  { %p499_p4 = pnand %p498_p3, %p492_p0 }
  0x16   :  { %458 = vmatmul.mubr.msk.bf16.gmra.mrb[4].mxu0 %vm99_vm0, %v489_v10  ;;  %466 = vmatmul.mubr.msk.bf16.gmra.mrb[4].mxu1 %vm99_vm0, %v490_v11 }
  0xe1   :  { %v455_v13 = vpop.f32.mrb[0].mxu0  ;;  %v463_v14 = vpop.f32.mrb[0].mxu1 }
  0xe2   :  { %v171_v15 = vadd.f32 %v455_v13, %v337_v12  ;;  %v203_v16 = vadd.f32 %v463_v14, %v337_v12  ;;  %v162_v17 = vpop.f32.mrb[1].mxu0  ;;  %v194_v18 = vpop.f32.mrb[1].mxu1 }
  0xe3   :  { %v163_v19 = vadd.f32 %v337_v12, %v162_v17  ;;  %v195_v20 = vadd.f32 %v337_v12, %v194_v18  ;;  %v456_v21 = vpop.f32.mrb[2].mxu0  ;;  %v464_v22 = vpop.f32.mrb[2].mxu1 }
  0xe4   :  { %v174_v23 = vadd.f32 %v456_v21, %v337_v12  ;;  %v206_v24 = vadd.f32 %v464_v22, %v337_v12  ;;  %v165_v25 = vpop.f32.mrb[3].mxu0  ;;  %v197_v26 = vpop.f32.mrb[3].mxu1  ;;  %v227_v29 = vmax.f32 %v171_v15, 0.0  ;;  %v235_v30 = vmax.f32 %v203_v16, 0.0 }
  0xe5   :  { %v166_v27 = vadd.f32 %v337_v12, %v165_v25  ;;  %v198_v28 = vadd.f32 %v337_v12, %v197_v26  ;;  %v225_v33 = vmax.f32 %v163_v19, 0.0  ;;  %v233_v34 = vmax.f32 %v195_v20, 0.0 }
  0xe6   :  { %v228_v31 = vmax.f32 %v174_v23, 0.0  ;;  %v236_v32 = vmax.f32 %v206_v24, 0.0 }
  0xe7   :  { %v226_v35 = vmax.f32 %v166_v27, 0.0  ;;  %v234_v36 = vmax.f32 %v198_v28, 0.0 }
  0xe8   :  { %v397_v37 = vpack.c.bf16 %v228_v31, %v227_v29  ;;  %v417_v38 = vpack.c.bf16 %v236_v32, %v235_v30 }
  0xe9   :  { %v392_v39 = vpack.c.bf16 %v226_v35, %v225_v33  ;;  %v412_v40 = vpack.c.bf16 %v234_v36, %v233_v34  ;;  %v459_v41 = vpop.f32.mrb[4].mxu0  ;;  %v467_v42 = vpop.f32.mrb[4].mxu1 }
  0xea   :  { %429 = vst [vmem:[#allocation2 + $0x8] sm:$0xff] %v397_v37   ;;  %433 = vst [vmem:[#allocation2 + $0x28] sm:$0xff] %v417_v38   ;;  %v187_v43 = vadd.f32 %v459_v41, %v337_v12  ;;  %v219_v44 = vadd.f32 %v467_v42, %v337_v12  ;;  %v178_v45 = vpop.f32.mrb[5].mxu0  ;;  %v210_v46 = vpop.f32.mrb[5].mxu1 }
  0xeb   :  { %393 = vst [vmem:[#allocation2] sm:$0xff] %v392_v39   ;;  %432 = vst [vmem:[#allocation2 + $0x20] sm:$0xff] %v412_v40   ;;  %v179_v47 = vadd.f32 %v337_v12, %v178_v45  ;;  %v211_v48 = vadd.f32 %v337_v12, %v210_v46  ;;  %v460_v49 = vpop.f32.mrb[6].mxu0  ;;  %v468_v50 = vpop.f32.mrb[6].mxu1 }
  0xec   :  { %v190_v51 = vadd.f32 %v460_v49, %v337_v12  ;;  %v222_v52 = vadd.f32 %v468_v50, %v337_v12  ;;  %v181_v53 = vpop.f32.mrb[7].mxu0  ;;  %v213_v54 = vpop.f32.mrb[7].mxu1  ;;  %v231_v57 = vmax.f32 %v187_v43, 0.0  ;;  %v239_v58 = vmax.f32 %v219_v44, 0.0 }
  0xed   :  { %v182_v55 = vadd.f32 %v337_v12, %v181_v53  ;;  %v214_v56 = vadd.f32 %v337_v12, %v213_v54  ;;  %v229_v61 = vmax.f32 %v179_v47, 0.0  ;;  %v237_v62 = vmax.f32 %v211_v48, 0.0 }
  0xee   :  { %v232_v59 = vmax.f32 %v190_v51, 0.0  ;;  %v240_v60 = vmax.f32 %v222_v52, 0.0 }
  0xef   :  { %v230_v63 = vmax.f32 %v182_v55, 0.0  ;;  %v238_v0 = vmax.f32 %v214_v56, 0.0 }
  0xf0   :  { %v407_v1 = vpack.c.bf16 %v232_v59, %v231_v57  ;;  %v427_v2 = vpack.c.bf16 %v240_v60, %v239_v58 }
  0xf1   :  { %v402_v3 = vpack.c.bf16 %v230_v63, %v229_v61  ;;  %v422_v4 = vpack.c.bf16 %v238_v0, %v237_v62 }
  0xf2   :  { %431 = vst [vmem:[#allocation2 + $0x18] sm:$0xff] %v407_v1   ;;  %435 = vst [vmem:[#allocation2 + $0x38] sm:$0xff] %v427_v2  }
  0xf3   :  { %430 = vst [vmem:[#allocation2 + $0x10] sm:$0xff] %v402_v3   ;;  %434 = vst [vmem:[#allocation2 + $0x30] sm:$0xff] %v422_v4  }
  0xf4   :  { %502 = shalt.err (!%p499_p4)
}
  0xf5   :  { %s503_s11 = scalar_lea.hbm %s597_s3, 1024 }
  0xf6   :  { %p504_p5 = scmp.ne.s32.totalorder %s597_s3, %s503_s11  ;;  %p507_p6 = scmp.lt.u32.totalorder %s503_s11, %s597_s3 }
  0xf8   :  { %p509_p7 = pnand %p507_p6, %p504_p5 }
  0xfa   :  { %512 = shalt.err (!%p509_p7)
}
  0xfb   :  { %s516_s16 = smov 64   ;;  %s517_s17 = smov 4  }
  0xfc   :  { %332 = dma.vmem_to_hbm [thread:$0]  %s327_s2, 1024, %s597_s3, [#allocation3], %s516_s16, %s516_s16, %s517_s17  }
  0xfd   :  { %513 = dma.done.wait [#allocation3], 1024  }
  0xfe   :  { %514 = vsyncadd [#allocation3], 4294966272 }
  0xff   :  { %336 = vsyncpa [#allocation3], 1 }

</bundles_post_ra>
